<compile_context>
chip_gen: v5e
topology: v5e:2x2
jax: 0.10.0
libtpu: 0.0.40
codegen_flags: <defaults>
</compile_context>

<pallas_src>
import math
from functools import partial

import jax
import jax.numpy as jnp
from jax.experimental import pallas as pl
from jax.experimental.pallas import tpu as pltpu


def mha_kernel(x_ref, wqkv_ref, wout_ref, bout_ref, out_ref, *,
               n_heads: int, batch: int, seq: int, causal: bool):
    # x_ref:    (B*T, C)  f32     batch folded into rows
    # wqkv_ref: (C, 3C)   bf16    qkv weight.T, 1/sqrt(hd) pre-folded into Q cols
    # wout_ref: (C, Cp)   bf16    out weight.T, zero-padded to Cp lanes
    # bout_ref: (1, Cp)   f32     out bias, zero-padded
    # out_ref:  (B*T, Cp) f32     lane-dense (Cp multiple of 128)
    C = x_ref.shape[1]
    hd = C // n_heads

    # ---- QKV projection: one MXU matmul over all batch rows (bf16 in, f32 acc) ----
    qkv = jnp.dot(x_ref[...].astype(jnp.bfloat16), wqkv_ref[...],
                  preferred_element_type=jnp.float32)              # (B*T, 3C) f32
    # One cast of the whole slab; per-head MXU operands are slices of this.
    qkv_bf = qkv.astype(jnp.bfloat16)                              # (B*T, 3C) bf16

    # ---- in-kernel additive causal mask: 0 where allowed, -1e30 where masked ----
    if causal:
        row = jax.lax.broadcasted_iota(jnp.int32, (seq, seq), 0)
        col = jax.lax.broadcasted_iota(jnp.int32, (seq, seq), 1)
        neg_mask = jnp.where(col <= row, 0.0, -1e30).astype(jnp.float32)
    else:
        neg_mask = None

    # ---- per-(batch, head) attention; ctx blocks lane-concatenated ----
    ctx_rows = []
    for b in range(batch):          # static loop: B=2, trivially small
        r0 = b * seq
        head_ctx = []
        for h in range(n_heads):    # static loop over heads (2-D slices only)
            c0 = h * hd
            q = qkv_bf[r0:r0 + seq, c0:c0 + hd]                    # (T, hd) bf16 (pre-scaled)
            k = qkv_bf[r0:r0 + seq, C + c0:C + c0 + hd]            # (T, hd) bf16
            v = qkv_bf[r0:r0 + seq, 2 * C + c0:2 * C + c0 + hd]    # (T, hd) bf16

            # scores with the KV-sequence axis on lanes: q @ k^T -> (T, T), f32 acc
            s = jax.lax.dot_general(
                q, k, dimension_numbers=(((1,), (1,)), ((), ())),
                preferred_element_type=jnp.float32)
            if causal:
                s = s + neg_mask

            # softmax entirely in f32 (v5e-safe); exact divide on the (T,1) denom
            m = jnp.max(s, axis=-1, keepdims=True)
            p = jnp.exp(s - m)
            denom = jnp.sum(p, axis=-1, keepdims=True)
            attn = p / denom                                       # (T, T) f32
            # attn_dropout: identity (inference)

            ctx = jnp.dot(attn.astype(jnp.bfloat16), v,
                          preferred_element_type=jnp.float32)      # (T, hd) f32
            head_ctx.append(ctx)

        ctx_rows.append(jnp.concatenate(head_ctx, axis=-1))        # (T, C) f32

    ctx_all = jnp.concatenate(ctx_rows, axis=0)                    # (B*T, C) f32

    # ---- single output projection + single bias add + one full-lane store ----
    out = jnp.dot(ctx_all.astype(jnp.bfloat16), wout_ref[...],
                  preferred_element_type=jnp.float32) + bout_ref[...]
    # resid_dropout: identity (inference)
    out_ref[...] = out.astype(out_ref.dtype)


@partial(jax.jit, static_argnames=("n_heads", "causal"))
def multi_head_attention(x, w_qkv, w_out, b_out, *, n_heads, causal=True):
    """x: (B, T, C) f32.  w_qkv: (C, 3C) = qkv weight.T (no bias).
    w_out: (C, C) = out weight.T.  b_out: (C,).  Returns (B, T, C)."""
    B, T, C = x.shape
    assert C % n_heads == 0, "d_model must be divisible by n_heads"
    hd = C // n_heads
    Cp = ((C + 127) // 128) * 128                    # lane-dense output width

    x2d = x.reshape(B * T, C)

    # Fold 1/sqrt(hd) into the Q columns of the qkv weight (weight-side constant),
    # then cast to bf16 MXU operands (f32 accumulation happens in-kernel).
    scale = jnp.concatenate([
        jnp.full((C,), 1.0 / math.sqrt(hd), dtype=jnp.float32),
        jnp.ones((2 * C,), dtype=jnp.float32)])
    w_qkv_bf16 = (w_qkv * scale[None, :]).astype(jnp.bfloat16)

    # Zero-pad the output projection so the kernel's store is a full 128-lane vst.
    w_out_p = jnp.pad(w_out.astype(jnp.bfloat16), ((0, 0), (0, Cp - C)))
    b_out_p = jnp.pad(b_out.astype(jnp.float32), (0, Cp - C)).reshape(1, Cp)

    kernel = partial(mha_kernel, n_heads=n_heads, batch=B, seq=T, causal=causal)
    out_p = pl.pallas_call(
        kernel,
        out_shape=jax.ShapeDtypeStruct((B * T, Cp), x.dtype),
        in_specs=[
            pl.BlockSpec(memory_space=pltpu.MemorySpace.VMEM),   # x2d (B*T, C)
            pl.BlockSpec(memory_space=pltpu.MemorySpace.VMEM),   # w_qkv (C, 3C)
            pl.BlockSpec(memory_space=pltpu.MemorySpace.VMEM),   # w_out padded (C, Cp)
            pl.BlockSpec(memory_space=pltpu.MemorySpace.VMEM),   # b_out padded (1, Cp)
        ],
        out_specs=pl.BlockSpec(memory_space=pltpu.MemorySpace.VMEM),
        # Single invocation (grid=()): per-grid-step overhead would dominate at
        # this size. Once per-batch work exceeds ~1 µs (T>=128 or C>=256), add a
        # leading batch grid axis with dimension_semantics=("parallel",) so
        # v7x's second TensorCore is used.
    )(x2d, w_qkv_bf16, w_out_p, b_out_p)

    return out_p[:, :C].reshape(B, T, C)


if __name__ == "__main__":
    # config: d_model=32, n_heads=4, n_ctx=8, mask_type='causal', dropout=0.0
    B, T, C = 2, 8, 32
    n_heads = 4

    key = jax.random.PRNGKey(0)
    k_x, k_qkv, k_wo, k_bo = jax.random.split(key, 4)

    x = jax.random.normal(k_x, (B, T, C), dtype=jnp.float32)

    # Deterministic parameter init (shapes match the nn.Module's __init__).
    # PyTorch Linear weight is (out, in); we store the transposed (in, out) form.
    w_qkv = jax.random.normal(k_qkv, (C, 3 * C), dtype=jnp.float32) * (1.0 / math.sqrt(C))
    w_out = jax.random.normal(k_wo, (C, C), dtype=jnp.float32) * (1.0 / math.sqrt(C))
    b_out = jax.random.normal(k_bo, (C,), dtype=jnp.float32) * 0.01

    out = multi_head_attention(x, w_qkv, w_out, b_out, n_heads=n_heads)
    jax.block_until_ready(out)

    # pure-JAX f32 reference (matches the PyTorch module in eval mode)
    def ref(x):
        qkv = x @ w_qkv
        q, k, v = jnp.split(qkv, 3, axis=-1)
        hd = C // n_heads
        q = q.reshape(B, T, n_heads, hd).transpose(0, 2, 1, 3)
        k = k.reshape(B, T, n_heads, hd).transpose(0, 2, 1, 3)
        v = v.reshape(B, T, n_heads, hd).transpose(0, 2, 1, 3)
        mask = jnp.tril(jnp.ones((T, T), dtype=jnp.float32))
        s = q @ jnp.swapaxes(k, -2, -1) / math.sqrt(hd)
        s = jnp.where(mask[None, None] == 0.0, -jnp.inf, s)
        p = jax.nn.softmax(s, axis=-1)
        ctx = (p @ v).transpose(0, 2, 1, 3).reshape(B, T, C)
        return ctx @ w_out + b_out

    r = ref(x)
    # bf16 MXU operands => loosened tolerance vs the f32 reference
    err = float(jnp.max(jnp.abs(out - r)))
    assert jnp.allclose(out, r, atol=5e-2, rtol=5e-2), f"max abs err = {err}"
    print("KERNEL_OK")
</pallas_src>

<mosaic_0001>
module attributes {stable_mosaic.version = 11 : i64} {
  func.func @mha_kernel(%arg0: memref<16x32xf32, #tpu.memory_space<vmem>>, %arg1: memref<32x96xbf16, #tpu.memory_space<vmem>>, %arg2: memref<32x128xbf16, #tpu.memory_space<vmem>>, %arg3: memref<1x128xf32, #tpu.memory_space<vmem>>, %arg4: memref<16x128xf32, #tpu.memory_space<vmem>>) attributes {dimension_semantics = [], scalar_prefetch = 0 : i64, scratch_operands = 0 : i64, tpu.core_type = #tpu.core_type<tc>} {
    %c0 = arith.constant 0 : index
    %c0_0 = arith.constant 0 : index
    %0 = vector.load %arg0[%c0, %c0_0] : memref<16x32xf32, #tpu.memory_space<vmem>>, vector<16x32xf32>
    %1 = arith.truncf %0 : vector<16x32xf32> to vector<16x32xbf16>
    %c0_1 = arith.constant 0 : index
    %c0_2 = arith.constant 0 : index
    %2 = vector.load %arg1[%c0_1, %c0_2] : memref<32x96xbf16, #tpu.memory_space<vmem>>, vector<32x96xbf16>
    %cst = arith.constant dense<0.000000e+00> : vector<16x96xf32>
    %3 = tpu.matmul %1, %2, %cst {dimension_numbers = #tpu.dot_dimension_numbers<[1], [0], [0], [1], [0, 0, 1, 1], [], []>} : vector<16x32xbf16>, vector<32x96xbf16>, vector<16x96xf32> -> vector<16x96xf32>
    %4 = arith.truncf %3 : vector<16x96xf32> to vector<16x96xbf16>
    %5 = tpu.iota {dimensions = array<i32: 0>} : vector<8x8xi32>
    %6 = tpu.iota {dimensions = array<i32: 1>} : vector<8x8xi32>
    %7 = arith.cmpi sle, %6, %5 : vector<8x8xi32>
    %cst_3 = arith.constant 0.000000e+00 : f32
    %cst_4 = arith.constant -1.000000e+30 : f32
    %8 = vector.broadcast %cst_3 : f32 to vector<8x8xf32>
    %9 = vector.broadcast %cst_4 : f32 to vector<8x8xf32>
    %10 = arith.select %7, %8, %9 : vector<8x8xi1>, vector<8x8xf32>
    %11 = vector.extract_strided_slice %4 {offsets = [0, 0], sizes = [8, 8], strides = [1, 1]} : vector<16x96xbf16> to vector<8x8xbf16>
    %12 = vector.extract_strided_slice %4 {offsets = [0, 32], sizes = [8, 8], strides = [1, 1]} : vector<16x96xbf16> to vector<8x8xbf16>
    %13 = vector.extract_strided_slice %4 {offsets = [0, 64], sizes = [8, 8], strides = [1, 1]} : vector<16x96xbf16> to vector<8x8xbf16>
    %cst_5 = arith.constant dense<0.000000e+00> : vector<8x8xf32>
    %14 = tpu.matmul %11, %12, %cst_5 {dimension_numbers = #tpu.dot_dimension_numbers<[1], [1], [0], [0], [0, 0, 1, 0], [], []>} : vector<8x8xbf16>, vector<8x8xbf16>, vector<8x8xf32> -> vector<8x8xf32>
    %15 = arith.addf %14, %10 : vector<8x8xf32>
    %cst_6 = arith.constant dense<0xFF800000> : vector<8xf32>
    %16 = vector.multi_reduction <maximumf>, %15, %cst_6 [1] : vector<8x8xf32> to vector<8xf32>
    %17 = vector.shape_cast %16 : vector<8xf32> to vector<8x1xf32>
    %18 = vector.broadcast %17 : vector<8x1xf32> to vector<8x8xf32>
    %19 = arith.subf %15, %18 : vector<8x8xf32>
    %20 = math.exp %19 : vector<8x8xf32>
    %cst_7 = arith.constant dense<0.000000e+00> : vector<8xf32>
    %21 = vector.multi_reduction <add>, %20, %cst_7 [1] : vector<8x8xf32> to vector<8xf32>
    %22 = vector.shape_cast %21 : vector<8xf32> to vector<8x1xf32>
    %23 = vector.broadcast %22 : vector<8x1xf32> to vector<8x8xf32>
    %24 = arith.divf %20, %23 : vector<8x8xf32>
    %25 = arith.truncf %24 : vector<8x8xf32> to vector<8x8xbf16>
    %cst_8 = arith.constant dense<0.000000e+00> : vector<8x8xf32>
    %26 = tpu.matmul %25, %13, %cst_8 {dimension_numbers = #tpu.dot_dimension_numbers<[1], [0], [0], [1], [0, 0, 1, 1], [], []>} : vector<8x8xbf16>, vector<8x8xbf16>, vector<8x8xf32> -> vector<8x8xf32>
    %27 = vector.extract_strided_slice %4 {offsets = [0, 8], sizes = [8, 8], strides = [1, 1]} : vector<16x96xbf16> to vector<8x8xbf16>
    %28 = vector.extract_strided_slice %4 {offsets = [0, 40], sizes = [8, 8], strides = [1, 1]} : vector<16x96xbf16> to vector<8x8xbf16>
    %29 = vector.extract_strided_slice %4 {offsets = [0, 72], sizes = [8, 8], strides = [1, 1]} : vector<16x96xbf16> to vector<8x8xbf16>
    %cst_9 = arith.constant dense<0.000000e+00> : vector<8x8xf32>
    %30 = tpu.matmul %27, %28, %cst_9 {dimension_numbers = #tpu.dot_dimension_numbers<[1], [1], [0], [0], [0, 0, 1, 0], [], []>} : vector<8x8xbf16>, vector<8x8xbf16>, vector<8x8xf32> -> vector<8x8xf32>
    %31 = arith.addf %30, %10 : vector<8x8xf32>
    %cst_10 = arith.constant dense<0xFF800000> : vector<8xf32>
    %32 = vector.multi_reduction <maximumf>, %31, %cst_10 [1] : vector<8x8xf32> to vector<8xf32>
    %33 = vector.shape_cast %32 : vector<8xf32> to vector<8x1xf32>
    %34 = vector.broadcast %33 : vector<8x1xf32> to vector<8x8xf32>
    %35 = arith.subf %31, %34 : vector<8x8xf32>
    %36 = math.exp %35 : vector<8x8xf32>
    %cst_11 = arith.constant dense<0.000000e+00> : vector<8xf32>
    %37 = vector.multi_reduction <add>, %36, %cst_11 [1] : vector<8x8xf32> to vector<8xf32>
    %38 = vector.shape_cast %37 : vector<8xf32> to vector<8x1xf32>
    %39 = vector.broadcast %38 : vector<8x1xf32> to vector<8x8xf32>
    %40 = arith.divf %36, %39 : vector<8x8xf32>
    %41 = arith.truncf %40 : vector<8x8xf32> to vector<8x8xbf16>
    %cst_12 = arith.constant dense<0.000000e+00> : vector<8x8xf32>
    %42 = tpu.matmul %41, %29, %cst_12 {dimension_numbers = #tpu.dot_dimension_numbers<[1], [0], [0], [1], [0, 0, 1, 1], [], []>} : vector<8x8xbf16>, vector<8x8xbf16>, vector<8x8xf32> -> vector<8x8xf32>
    %43 = vector.extract_strided_slice %4 {offsets = [0, 16], sizes = [8, 8], strides = [1, 1]} : vector<16x96xbf16> to vector<8x8xbf16>
    %44 = vector.extract_strided_slice %4 {offsets = [0, 48], sizes = [8, 8], strides = [1, 1]} : vector<16x96xbf16> to vector<8x8xbf16>
    %45 = vector.extract_strided_slice %4 {offsets = [0, 80], sizes = [8, 8], strides = [1, 1]} : vector<16x96xbf16> to vector<8x8xbf16>
    %cst_13 = arith.constant dense<0.000000e+00> : vector<8x8xf32>
    %46 = tpu.matmul %43, %44, %cst_13 {dimension_numbers = #tpu.dot_dimension_numbers<[1], [1], [0], [0], [0, 0, 1, 0], [], []>} : vector<8x8xbf16>, vector<8x8xbf16>, vector<8x8xf32> -> vector<8x8xf32>
    %47 = arith.addf %46, %10 : vector<8x8xf32>
    %cst_14 = arith.constant dense<0xFF800000> : vector<8xf32>
    %48 = vector.multi_reduction <maximumf>, %47, %cst_14 [1] : vector<8x8xf32> to vector<8xf32>
    %49 = vector.shape_cast %48 : vector<8xf32> to vector<8x1xf32>
    %50 = vector.broadcast %49 : vector<8x1xf32> to vector<8x8xf32>
    %51 = arith.subf %47, %50 : vector<8x8xf32>
    %52 = math.exp %51 : vector<8x8xf32>
    %cst_15 = arith.constant dense<0.000000e+00> : vector<8xf32>
    %53 = vector.multi_reduction <add>, %52, %cst_15 [1] : vector<8x8xf32> to vector<8xf32>
    %54 = vector.shape_cast %53 : vector<8xf32> to vector<8x1xf32>
    %55 = vector.broadcast %54 : vector<8x1xf32> to vector<8x8xf32>
    %56 = arith.divf %52, %55 : vector<8x8xf32>
    %57 = arith.truncf %56 : vector<8x8xf32> to vector<8x8xbf16>
    %cst_16 = arith.constant dense<0.000000e+00> : vector<8x8xf32>
    %58 = tpu.matmul %57, %45, %cst_16 {dimension_numbers = #tpu.dot_dimension_numbers<[1], [0], [0], [1], [0, 0, 1, 1], [], []>} : vector<8x8xbf16>, vector<8x8xbf16>, vector<8x8xf32> -> vector<8x8xf32>
    %59 = vector.extract_strided_slice %4 {offsets = [0, 24], sizes = [8, 8], strides = [1, 1]} : vector<16x96xbf16> to vector<8x8xbf16>
    %60 = vector.extract_strided_slice %4 {offsets = [0, 56], sizes = [8, 8], strides = [1, 1]} : vector<16x96xbf16> to vector<8x8xbf16>
    %61 = vector.extract_strided_slice %4 {offsets = [0, 88], sizes = [8, 8], strides = [1, 1]} : vector<16x96xbf16> to vector<8x8xbf16>
    %cst_17 = arith.constant dense<0.000000e+00> : vector<8x8xf32>
    %62 = tpu.matmul %59, %60, %cst_17 {dimension_numbers = #tpu.dot_dimension_numbers<[1], [1], [0], [0], [0, 0, 1, 0], [], []>} : vector<8x8xbf16>, vector<8x8xbf16>, vector<8x8xf32> -> vector<8x8xf32>
    %63 = arith.addf %62, %10 : vector<8x8xf32>
    %cst_18 = arith.constant dense<0xFF800000> : vector<8xf32>
    %64 = vector.multi_reduction <maximumf>, %63, %cst_18 [1] : vector<8x8xf32> to vector<8xf32>
    %65 = vector.shape_cast %64 : vector<8xf32> to vector<8x1xf32>
    %66 = vector.broadcast %65 : vector<8x1xf32> to vector<8x8xf32>
    %67 = arith.subf %63, %66 : vector<8x8xf32>
    %68 = math.exp %67 : vector<8x8xf32>
    %cst_19 = arith.constant dense<0.000000e+00> : vector<8xf32>
    %69 = vector.multi_reduction <add>, %68, %cst_19 [1] : vector<8x8xf32> to vector<8xf32>
    %70 = vector.shape_cast %69 : vector<8xf32> to vector<8x1xf32>
    %71 = vector.broadcast %70 : vector<8x1xf32> to vector<8x8xf32>
    %72 = arith.divf %68, %71 : vector<8x8xf32>
    %73 = arith.truncf %72 : vector<8x8xf32> to vector<8x8xbf16>
    %cst_20 = arith.constant dense<0.000000e+00> : vector<8x8xf32>
    %74 = tpu.matmul %73, %61, %cst_20 {dimension_numbers = #tpu.dot_dimension_numbers<[1], [0], [0], [1], [0, 0, 1, 1], [], []>} : vector<8x8xbf16>, vector<8x8xbf16>, vector<8x8xf32> -> vector<8x8xf32>
    %75 = tpu.concatenate %26, %42, %58, %74 in 1 : vector<8x8xf32>, vector<8x8xf32>, vector<8x8xf32>, vector<8x8xf32> -> vector<8x32xf32>
    %76 = vector.extract_strided_slice %4 {offsets = [8, 0], sizes = [8, 8], strides = [1, 1]} : vector<16x96xbf16> to vector<8x8xbf16>
    %77 = vector.extract_strided_slice %4 {offsets = [8, 32], sizes = [8, 8], strides = [1, 1]} : vector<16x96xbf16> to vector<8x8xbf16>
    %78 = vector.extract_strided_slice %4 {offsets = [8, 64], sizes = [8, 8], strides = [1, 1]} : vector<16x96xbf16> to vector<8x8xbf16>
    %cst_21 = arith.constant dense<0.000000e+00> : vector<8x8xf32>
    %79 = tpu.matmul %76, %77, %cst_21 {dimension_numbers = #tpu.dot_dimension_numbers<[1], [1], [0], [0], [0, 0, 1, 0], [], []>} : vector<8x8xbf16>, vector<8x8xbf16>, vector<8x8xf32> -> vector<8x8xf32>
    %80 = arith.addf %79, %10 : vector<8x8xf32>
    %cst_22 = arith.constant dense<0xFF800000> : vector<8xf32>
    %81 = vector.multi_reduction <maximumf>, %80, %cst_22 [1] : vector<8x8xf32> to vector<8xf32>
    %82 = vector.shape_cast %81 : vector<8xf32> to vector<8x1xf32>
    %83 = vector.broadcast %82 : vector<8x1xf32> to vector<8x8xf32>
    %84 = arith.subf %80, %83 : vector<8x8xf32>
    %85 = math.exp %84 : vector<8x8xf32>
    %cst_23 = arith.constant dense<0.000000e+00> : vector<8xf32>
    %86 = vector.multi_reduction <add>, %85, %cst_23 [1] : vector<8x8xf32> to vector<8xf32>
    %87 = vector.shape_cast %86 : vector<8xf32> to vector<8x1xf32>
    %88 = vector.broadcast %87 : vector<8x1xf32> to vector<8x8xf32>
    %89 = arith.divf %85, %88 : vector<8x8xf32>
    %90 = arith.truncf %89 : vector<8x8xf32> to vector<8x8xbf16>
    %cst_24 = arith.constant dense<0.000000e+00> : vector<8x8xf32>
    %91 = tpu.matmul %90, %78, %cst_24 {dimension_numbers = #tpu.dot_dimension_numbers<[1], [0], [0], [1], [0, 0, 1, 1], [], []>} : vector<8x8xbf16>, vector<8x8xbf16>, vector<8x8xf32> -> vector<8x8xf32>
    %92 = vector.extract_strided_slice %4 {offsets = [8, 8], sizes = [8, 8], strides = [1, 1]} : vector<16x96xbf16> to vector<8x8xbf16>
    %93 = vector.extract_strided_slice %4 {offsets = [8, 40], sizes = [8, 8], strides = [1, 1]} : vector<16x96xbf16> to vector<8x8xbf16>
    %94 = vector.extract_strided_slice %4 {offsets = [8, 72], sizes = [8, 8], strides = [1, 1]} : vector<16x96xbf16> to vector<8x8xbf16>
    %cst_25 = arith.constant dense<0.000000e+00> : vector<8x8xf32>
    %95 = tpu.matmul %92, %93, %cst_25 {dimension_numbers = #tpu.dot_dimension_numbers<[1], [1], [0], [0], [0, 0, 1, 0], [], []>} : vector<8x8xbf16>, vector<8x8xbf16>, vector<8x8xf32> -> vector<8x8xf32>
    %96 = arith.addf %95, %10 : vector<8x8xf32>
    %cst_26 = arith.constant dense<0xFF800000> : vector<8xf32>
    %97 = vector.multi_reduction <maximumf>, %96, %cst_26 [1] : vector<8x8xf32> to vector<8xf32>
    %98 = vector.shape_cast %97 : vector<8xf32> to vector<8x1xf32>
    %99 = vector.broadcast %98 : vector<8x1xf32> to vector<8x8xf32>
    %100 = arith.subf %96, %99 : vector<8x8xf32>
    %101 = math.exp %100 : vector<8x8xf32>
    %cst_27 = arith.constant dense<0.000000e+00> : vector<8xf32>
    %102 = vector.multi_reduction <add>, %101, %cst_27 [1] : vector<8x8xf32> to vector<8xf32>
    %103 = vector.shape_cast %102 : vector<8xf32> to vector<8x1xf32>
    %104 = vector.broadcast %103 : vector<8x1xf32> to vector<8x8xf32>
    %105 = arith.divf %101, %104 : vector<8x8xf32>
    %106 = arith.truncf %105 : vector<8x8xf32> to vector<8x8xbf16>
    %cst_28 = arith.constant dense<0.000000e+00> : vector<8x8xf32>
    %107 = tpu.matmul %106, %94, %cst_28 {dimension_numbers = #tpu.dot_dimension_numbers<[1], [0], [0], [1], [0, 0, 1, 1], [], []>} : vector<8x8xbf16>, vector<8x8xbf16>, vector<8x8xf32> -> vector<8x8xf32>
    %108 = vector.extract_strided_slice %4 {offsets = [8, 16], sizes = [8, 8], strides = [1, 1]} : vector<16x96xbf16> to vector<8x8xbf16>
    %109 = vector.extract_strided_slice %4 {offsets = [8, 48], sizes = [8, 8], strides = [1, 1]} : vector<16x96xbf16> to vector<8x8xbf16>
    %110 = vector.extract_strided_slice %4 {offsets = [8, 80], sizes = [8, 8], strides = [1, 1]} : vector<16x96xbf16> to vector<8x8xbf16>
    %cst_29 = arith.constant dense<0.000000e+00> : vector<8x8xf32>
    %111 = tpu.matmul %108, %109, %cst_29 {dimension_numbers = #tpu.dot_dimension_numbers<[1], [1], [0], [0], [0, 0, 1, 0], [], []>} : vector<8x8xbf16>, vector<8x8xbf16>, vector<8x8xf32> -> vector<8x8xf32>
    %112 = arith.addf %111, %10 : vector<8x8xf32>
    %cst_30 = arith.constant dense<0xFF800000> : vector<8xf32>
    %113 = vector.multi_reduction <maximumf>, %112, %cst_30 [1] : vector<8x8xf32> to vector<8xf32>
    %114 = vector.shape_cast %113 : vector<8xf32> to vector<8x1xf32>
    %115 = vector.broadcast %114 : vector<8x1xf32> to vector<8x8xf32>
    %116 = arith.subf %112, %115 : vector<8x8xf32>
    %117 = math.exp %116 : vector<8x8xf32>
    %cst_31 = arith.constant dense<0.000000e+00> : vector<8xf32>
    %118 = vector.multi_reduction <add>, %117, %cst_31 [1] : vector<8x8xf32> to vector<8xf32>
    %119 = vector.shape_cast %118 : vector<8xf32> to vector<8x1xf32>
    %120 = vector.broadcast %119 : vector<8x1xf32> to vector<8x8xf32>
    %121 = arith.divf %117, %120 : vector<8x8xf32>
    %122 = arith.truncf %121 : vector<8x8xf32> to vector<8x8xbf16>
    %cst_32 = arith.constant dense<0.000000e+00> : vector<8x8xf32>
    %123 = tpu.matmul %122, %110, %cst_32 {dimension_numbers = #tpu.dot_dimension_numbers<[1], [0], [0], [1], [0, 0, 1, 1], [], []>} : vector<8x8xbf16>, vector<8x8xbf16>, vector<8x8xf32> -> vector<8x8xf32>
    %124 = vector.extract_strided_slice %4 {offsets = [8, 24], sizes = [8, 8], strides = [1, 1]} : vector<16x96xbf16> to vector<8x8xbf16>
    %125 = vector.extract_strided_slice %4 {offsets = [8, 56], sizes = [8, 8], strides = [1, 1]} : vector<16x96xbf16> to vector<8x8xbf16>
    %126 = vector.extract_strided_slice %4 {offsets = [8, 88], sizes = [8, 8], strides = [1, 1]} : vector<16x96xbf16> to vector<8x8xbf16>
    %cst_33 = arith.constant dense<0.000000e+00> : vector<8x8xf32>
    %127 = tpu.matmul %124, %125, %cst_33 {dimension_numbers = #tpu.dot_dimension_numbers<[1], [1], [0], [0], [0, 0, 1, 0], [], []>} : vector<8x8xbf16>, vector<8x8xbf16>, vector<8x8xf32> -> vector<8x8xf32>
    %128 = arith.addf %127, %10 : vector<8x8xf32>
    %cst_34 = arith.constant dense<0xFF800000> : vector<8xf32>
    %129 = vector.multi_reduction <maximumf>, %128, %cst_34 [1] : vector<8x8xf32> to vector<8xf32>
    %130 = vector.shape_cast %129 : vector<8xf32> to vector<8x1xf32>
    %131 = vector.broadcast %130 : vector<8x1xf32> to vector<8x8xf32>
    %132 = arith.subf %128, %131 : vector<8x8xf32>
    %133 = math.exp %132 : vector<8x8xf32>
    %cst_35 = arith.constant dense<0.000000e+00> : vector<8xf32>
    %134 = vector.multi_reduction <add>, %133, %cst_35 [1] : vector<8x8xf32> to vector<8xf32>
    %135 = vector.shape_cast %134 : vector<8xf32> to vector<8x1xf32>
    %136 = vector.broadcast %135 : vector<8x1xf32> to vector<8x8xf32>
    %137 = arith.divf %133, %136 : vector<8x8xf32>
    %138 = arith.truncf %137 : vector<8x8xf32> to vector<8x8xbf16>
    %cst_36 = arith.constant dense<0.000000e+00> : vector<8x8xf32>
    %139 = tpu.matmul %138, %126, %cst_36 {dimension_numbers = #tpu.dot_dimension_numbers<[1], [0], [0], [1], [0, 0, 1, 1], [], []>} : vector<8x8xbf16>, vector<8x8xbf16>, vector<8x8xf32> -> vector<8x8xf32>
    %140 = tpu.concatenate %91, %107, %123, %139 in 1 : vector<8x8xf32>, vector<8x8xf32>, vector<8x8xf32>, vector<8x8xf32> -> vector<8x32xf32>
    %141 = tpu.concatenate %75, %140 in 0 : vector<8x32xf32>, vector<8x32xf32> -> vector<16x32xf32>
    %142 = arith.truncf %141 : vector<16x32xf32> to vector<16x32xbf16>
    %c0_37 = arith.constant 0 : index
    %c0_38 = arith.constant 0 : index
    %143 = vector.load %arg2[%c0_37, %c0_38] : memref<32x128xbf16, #tpu.memory_space<vmem>>, vector<32x128xbf16>
    %cst_39 = arith.constant dense<0.000000e+00> : vector<16x128xf32>
    %144 = tpu.matmul %142, %143, %cst_39 {dimension_numbers = #tpu.dot_dimension_numbers<[1], [0], [0], [1], [0, 0, 1, 1], [], []>} : vector<16x32xbf16>, vector<32x128xbf16>, vector<16x128xf32> -> vector<16x128xf32>
    %c0_40 = arith.constant 0 : index
    %c0_41 = arith.constant 0 : index
    %145 = vector.load %arg3[%c0_40, %c0_41] : memref<1x128xf32, #tpu.memory_space<vmem>>, vector<1x128xf32>
    %146 = vector.broadcast %145 : vector<1x128xf32> to vector<16x128xf32>
    %147 = arith.addf %144, %146 : vector<16x128xf32>
    %c0_42 = arith.constant 0 : index
    %c0_43 = arith.constant 0 : index
    %148 = vector.load %arg4[%c0_42, %c0_43] : memref<16x128xf32, #tpu.memory_space<vmem>>, vector<16x128xf32>
    tpu.vector_store %arg4[%c0_42, %c0_43], %147 {strides = array<i32>} : memref<16x128xf32, #tpu.memory_space<vmem>>, vector<16x128xf32>,
    return
  }
}

</mosaic_0001>

<bundles_post_ra>
// kernel: multi_head_attention.1
= control target key start
LH: loop header
LB: loop body
LE: loop exit
PB: predicated region body
PF: predicated region fallthrough
CT: control target
= control target key end

     0   :  { %vm37_vm0 = vcmask 261120   ;;  %s796_s23 = smov 104   ;;  %s798_s24 = smov 96   ;;  %vm68_vm1 = vcmask 64512   ;;  %v57_v35 = vlaneseq  ;;  %v803_v38 = vmov -1e+30   ;;  %s992_s1 = inlined_call_operand.vmem [shape: bf16[32,96], index: 1, kind: input, shape index: {}]   ;;  %s993_s0 = inlined_call_operand.vmem [shape: f32[16,32], index: 0, kind: input, shape index: {}]   ;;  %s994_s3 = inlined_call_operand.vmem [shape: f32[1,128], index: 3, kind: input, shape index: {}]   ;;  %s995_s2 = inlined_call_operand.vmem [shape: bf16[32,128], index: 2, kind: input, shape index: {}]   ;;  %s996_s4 = inlined_call_operand.vmem [shape: f32[16,128], index: 4, kind: output, shape index: {}]  }
   0x1   :  { %v730_v0 = vld [vmem:[%s992_s1 + $0x8] sm:$0xff]  ;;  %v729_v1 = vld [vmem:[%s992_s1] sm:$0xff]  ;;  %s797_s1 = smov 120   ;;  %s800_s25 = smov 72   ;;  %vm118_vm3 = vcmask 1043456  }
   0x2   :  { %47 = vmatpush.bf16.msra.mxu0 %v730_v0  ;;  %v18_v2 = vld [vmem:[%s993_s0] sm:$0xff]  ;;  %v19_v3 = vld [vmem:[%s993_s0 + $0x8] sm:$0xff]  ;;  %s799_s0 = smov 80   ;;  %s801_s26 = smov 88   ;;  %v58_v36 = vshrl.u32 %v57_v35, 7  ;;  %v60_v37 = vand.u32 127, %v57_v35 }
   0x3   :  { %v20_v4 = vpack.c.bf16 %v19_v3, %v18_v2  ;;  %s802_s27 = smov 112   ;;  %s804_s28 = smov 64  }
   0x4   :  { %vm61_vm2 = vcmp.le.s32.totalorder %v60_v37, %v58_v36  ;;  %s805_s29 = smov 56   ;;  %s806_s30 = smov 40  }
   0x5   :  { %v62_v39 = vsel %vm61_vm2, 0.0, %v803_v38  ;;  %s807_s5 = smov 48   ;;  %s808_s6 = smov 8  }
   0x6   :  { %48 = vmatpush.bf16.msra.mxu0 %v729_v1  ;;  %s809_s7 = smov 24   ;;  %s810_s8 = smov 16  }
   0x9   :  { %703 = vmatmul.msk.bf16.vlgmr.msra.gmra.mxu0 %vm37_vm0, %v20_v4 }
  0x86   :  { %v50_v5 = vpop.f32.mrf.mxu0 }
  0x87   :  { %v55_v6 = vpack.c.bf16 %v50_v5, %v50_v5 }
  0x89   :  { %v64_v7 = vunpack.c.l.b16 %v55_v6 }
  0x8b   :  { %v849_v8 = vpack.c.b16 %v64_v7, %v64_v7 }
  0x8d   :  { %273 = vrot.lane.b32.xlu2 %v849_v8, %s796_s23  ;;  %135 = vrot.lane.b32.xlu1 %v849_v8, %s797_s1 }
  0x8e   :  { %66 = vrot.lane.b32.xlu0 %v849_v8, %s798_s24  ;;  %v52_v9 = vpop.f32.mrf.mxu0 }
  0x8f   :  { %v56_v10 = vpack.c.bf16 %v52_v9, %v52_v9 }
  0x91   :  { %v360_v11 = vunpack.c.l.b16 %v56_v10 }
  0x93   :  { %v857_v12 = vpack.c.b16 %v360_v11, %v360_v11 }
  0x95   :  { %206 = vrot.lane.b32.xlu2 %v849_v8, %s799_s0  ;;  %275 = vrot.lane.b32.xlu1 %v849_v8, %s800_s25 }
  0x96   :  { %137 = vrot.lane.b32.xlu0 %v849_v8, %s801_s26 }
  0x9d   :  { %204 = vrot.lane.b32.xlu1 %v849_v8, %s802_s27  ;;  %429 = vrot.lane.b32.xlu2 %v857_v12, %s797_s1 }
  0x9e   :  { %431 = vrot.lane.b32.xlu0 %v857_v12, %s801_s26 }
  0xa5   :  { %569 = vrot.lane.b32.xlu1 %v857_v12, %s800_s25  ;;  %567 = vrot.lane.b32.xlu2 %v857_v12, %s796_s23 }
  0xa6   :  { %362 = vrot.lane.b32.xlu0 %v857_v12, %s798_s24 }
  0xad   :  { %498 = vrot.lane.b32.xlu1 %v857_v12, %s802_s27 }
  0xae   :  { %500 = vrot.lane.b32.xlu0 %v857_v12, %s799_s0 }
  0xe7   :  { %v274_v13 = vpop.permute.xlu2 %273 }
  0xef   :  { %v207_v14 = vpop.permute.xlu2 %206 }
  0xf0   :  { %v212_v15 = vsel %vm68_vm1, %v207_v14, 0 }
  0xf1   :  { %221 = vmatpush.bf16.xpose.msrb.mxu0 %v212_v15 }
  0xf7   :  { %v430_v32 = vpop.permute.xlu2 %429 }
  0xff   :  { %v136_v16 = vpop.permute.xlu1 %135  ;;  %v568_v34 = vpop.permute.xlu2 %567 }
 0x100   :  { %v67_v17 = vpop.permute.xlu0 %66 }
 0x101   :  { %v73_v18 = vsel %vm68_vm1, %v67_v17, 0 }
 0x102   :  { %82 = vmatpush.bf16.xpose.msra.mxu1 %v73_v18 }
 0x107   :  { %v276_v19 = vpop.permute.xlu1 %275 }
 0x108   :  { %v138_v20 = vpop.permute.xlu0 %137  ;;  %v281_v21 = vsel %vm68_vm1, %v276_v19, 0 }
 0x109   :  { %704 = vmatmul.msk.bf16.vlgmr.msra.gmra.mxu1 %vm68_vm1, %v55_v6  ;;  %v143_v22 = vsel %vm68_vm1, %v138_v20, 0 }
 0x10a   :  { %152 = vmatpush.bf16.xpose.msra.mxu3 %v143_v22 }
 0x10f   :  { %v205_v23 = vpop.permute.xlu1 %204 }
 0x110   :  { %v432_v24 = vpop.permute.xlu0 %431  ;;  %708 = vmatmul.msk.bf16.vlgmr.msrb.gmra.mxu0 %vm68_vm1, %v205_v23 }
 0x111   :  { %v437_v25 = vsel %vm68_vm1, %v432_v24, 0  ;;  %706 = vmatmul.msk.bf16.vlgmr.msra.gmra.mxu3 %vm68_vm1, %v136_v16 }
 0x112   :  { %290 = vmatpush.bf16.xpose.msrb.mxu3 %v281_v21 }
 0x117   :  { %v570_v28 = vpop.permute.xlu1 %569 }
 0x118   :  { %v363_v26 = vpop.permute.xlu0 %362  ;;  %v575_v30 = vsel %vm68_vm1, %v570_v28, 0 }
 0x119   :  { %v368_v27 = vsel %vm68_vm1, %v363_v26, 0 }
 0x11a   :  { %446 = vmatpush.bf16.xpose.msra.mxu3 %v437_v25  ;;  %377 = vmatpush.bf16.xpose.msra.mxu0 %v368_v27 }
 0x11f   :  { %v499_v33 = vpop.permute.xlu1 %498 }
 0x120   :  { %v501_v29 = vpop.permute.xlu0 %500 }
 0x121   :  { %v506_v31 = vsel %vm68_vm1, %v501_v29, 0  ;;  %710 = vmatmul.msk.bf16.vlgmr.msrb.gmra.mxu3 %vm68_vm1, %v274_v13  ;;  %712 = vmatmul.msk.bf16.vlgmr.msra.gmra.mxu0 %vm68_vm1, %v56_v10 }
 0x122   :  { %584 = vmatpush.bf16.xpose.msrb.mxu3 %v575_v30  ;;  %515 = vmatpush.bf16.xpose.msrb.mxu0 %v506_v31 }
 0x131   :  { %714 = vmatmul.msk.bf16.vlgmr.msra.gmra.mxu3 %vm68_vm1, %v430_v32  ;;  %716 = vmatmul.msk.bf16.vlgmr.msrb.gmra.mxu0 %vm68_vm1, %v499_v33 }
 0x141   :  { %718 = vmatmul.msk.bf16.vlgmr.msrb.gmra.mxu3 %vm68_vm1, %v568_v34 }
 0x186   :  { %v84_v40 = vpop.f32.mrf.mxu1 }
 0x187   :  { %v85_v41 = vadd.f32 %v84_v40, %v62_v39 }
 0x189   :  { %v88_v42 = vsel %vm68_vm1, %v85_v41, -inf }
 0x18a   :  { %89 = vmax.xlane.f32.xlu2 %v88_v42 }
 0x18d   :  { %v223_v43 = vpop.f32.mrf.mxu0 }
 0x18e   :  { %v86_v44 = vpop.f32.mrf.mxu1  ;;  %v224_v45 = vadd.f32 %v223_v43, %v62_v39 }
 0x190   :  { %v227_v46 = vsel %vm68_vm1, %v224_v45, -inf }
 0x192   :  { %228 = vmax.xlane.f32.xlu2 %v227_v46 }
 0x194   :  { %v154_v47 = vpop.f32.mrf.mxu3 }
 0x195   :  { %v155_v48 = vadd.f32 %v154_v47, %v62_v39  ;;  %v225_v49 = vpop.f32.mrf.mxu0 }
 0x197   :  { %v158_v50 = vsel %vm68_vm1, %v155_v48, -inf }
 0x198   :  { %159 = vmax.xlane.f32.xlu0 %v158_v50 }
 0x19c   :  { %v156_v51 = vpop.f32.mrf.mxu3 }
 0x19e   :  { %v379_v52 = vpop.f32.mrf.mxu0 }
 0x19f   :  { %v380_v53 = vadd.f32 %v379_v52, %v62_v39 }
 0x1a1   :  { %v383_v54 = vsel %vm68_vm1, %v380_v53, -inf }
 0x1a2   :  { %384 = vmax.xlane.f32.xlu1 %v383_v54 }
 0x1a4   :  { %v292_v55 = vpop.f32.mrf.mxu3 }
 0x1a5   :  { %v293_v56 = vadd.f32 %v292_v55, %v62_v39 }
 0x1a6   :  { %v381_v57 = vpop.f32.mrf.mxu0 }
 0x1a7   :  { %v296_v58 = vsel %vm68_vm1, %v293_v56, -inf }
 0x1aa   :  { %113 = vrot.lane.b32.xlu2 %v849_v8, %s804_s28  ;;  %297 = vmax.xlane.f32.xlu1 %v296_v58 }
 0x1ac   :  { %v294_v59 = vpop.f32.mrf.mxu3 }
 0x1ae   :  { %v517_v60 = vpop.f32.mrf.mxu0 }
 0x1af   :  { %v894_v6 = vadd.f32 %v517_v60, %v62_v39 }
 0x1b1   :  { %v521_v7 = vsel %vm68_vm1, %v894_v6, -inf }
 0x1b4   :  { %v448_v61 = vpop.f32.mrf.mxu3 }
 0x1b5   :  { %v449_v2 = vadd.f32 %v448_v61, %v62_v39 }
 0x1b6   :  { %v519_v62 = vpop.f32.mrf.mxu0 }
 0x1b7   :  { %v452_v3 = vsel %vm68_vm1, %v449_v2, -inf }
 0x1bc   :  { %v450_v63 = vpop.f32.mrf.mxu3 }
 0x1c3   :  { %183 = vrot.lane.b32.xlu1 %v849_v8, %s805_s29 }
 0x1c4   :  { %v586_v0 = vpop.f32.mrf.mxu3 }
 0x1c5   :  { %v587_v4 = vadd.f32 %v586_v0, %v62_v39 }
 0x1c7   :  { %v590_v5 = vsel %vm68_vm1, %v587_v4, -inf }
 0x1cc   :  { %v588_v1 = vpop.f32.mrf.mxu3 }
 0x1d3   :  { %453 = vmax.xlane.f32.xlu2 %v452_v3 }
 0x1db   :  { %591 = vmax.xlane.f32.xlu2 %v590_v5 }
 0x1ed   :  { %522 = vmax.xlane.f32.xlu1 %v521_v7 }
 0x1f3   :  { %321 = vrot.lane.b32.xlu2 %v849_v8, %s806_s30 }
 0x1fd   :  { %v90_v9 = vpop.xlane.xlu2 %89 }
 0x1fe   :  { %v91_v10 = vsub.f32 %v85_v41, %v90_v9 }
 0x200   :  { %v92_v11 = vmul.f32 1.442695, %v91_v10 }
 0x202   :  { %764 = vpow2.f32 %v92_v11 }
 0x205   :  { %v229_v13 = vpop.xlane.xlu2 %228 }
 0x206   :  { %v230_v14 = vsub.f32 %v224_v45, %v229_v13  ;;  %252 = vrot.lane.b32.xlu1 %v849_v8, %s807_s5 }
 0x208   :  { %v902_v15 = vpop.eup %764  ;;  %v231_v16 = vmul.f32 1.442695, %v230_v14 }
 0x209   :  { %v94_v17 = vsel %vm68_vm1, %v902_v15, 0.0 }
 0x20a   :  { %766 = vpow2.f32 %v231_v16  ;;  %95 = vadd.xlane.f32.xlu0 %v94_v17 }
 0x20b   :  { %v160_v18 = vpop.xlane.xlu0 %159 }
 0x20c   :  { %v161_v19 = vsub.f32 %v155_v48, %v160_v18 }
 0x20d   :  { %v114_v20 = vpop.permute.xlu2 %113 }
 0x20e   :  { %v162_v21 = vmul.f32 1.442695, %v161_v19  ;;  %v120_v22 = vsel %vm118_vm3, %v114_v20, 0 }
 0x20f   :  { %129 = vmatpush.bf16.msra.mxu2 %v120_v22 }
 0x210   :  { %v907_v23 = vpop.eup %766  ;;  %768 = vpow2.f32 %v162_v21 }
 0x211   :  { %v233_v8 = vsel %vm68_vm1, %v907_v23, 0.0 }
 0x212   :  { %234 = vadd.xlane.f32.xlu0 %v233_v8 }
 0x215   :  { %v385_v24 = vpop.xlane.xlu1 %384 }
 0x216   :  { %v911_v25 = vpop.eup %768  ;;  %v386_v26 = vsub.f32 %v380_v53, %v385_v24 }
 0x217   :  { %v164_v28 = vsel %vm68_vm1, %v911_v25, 0.0 }
 0x218   :  { %v387_v27 = vmul.f32 1.442695, %v386_v26 }
 0x21a   :  { %770 = vpow2.f32 %v387_v27  ;;  %165 = vadd.xlane.f32.xlu0 %v164_v28 }
 0x21d   :  { %v298_v29 = vpop.xlane.xlu1 %297 }
 0x21e   :  { %v299_v30 = vsub.f32 %v293_v56, %v298_v29 }
 0x220   :  { %v915_v31 = vpop.eup %770  ;;  %v300_v32 = vmul.f32 1.442695, %v299_v30 }
 0x221   :  { %v389_v33 = vsel %vm68_vm1, %v915_v31, 0.0 }
 0x222   :  { %772 = vpow2.f32 %v300_v32  ;;  %390 = vadd.xlane.f32.xlu0 %v389_v33 }
 0x228   :  { %v919_v34 = vpop.eup %772 }
 0x229   :  { %v302_v35 = vsel %vm68_vm1, %v919_v34, 0.0 }
 0x22a   :  { %303 = vadd.xlane.f32.xlu0 %v302_v35 }
 0x235   :  { %v184_v36 = vpop.permute.xlu1 %183 }
 0x236   :  { %v189_v37 = vsel %vm118_vm3, %v184_v36, 0 }
 0x237   :  { %198 = vmatpush.bf16.msrb.mxu2 %v189_v37 }
 0x246   :  { %v454_v38 = vpop.xlane.xlu2 %453 }
 0x247   :  { %v455_v39 = vsub.f32 %v449_v2, %v454_v38 }
 0x249   :  { %v456_v40 = vmul.f32 1.442695, %v455_v39 }
 0x24b   :  { %774 = vpow2.f32 %v456_v40 }
 0x24e   :  { %v592_v41 = vpop.xlane.xlu2 %591 }
 0x24f   :  { %v593_v42 = vsub.f32 %v587_v4, %v592_v41 }
 0x251   :  { %v924_v43 = vpop.eup %774  ;;  %v594_v44 = vmul.f32 1.442695, %v593_v42 }
 0x252   :  { %v458_v45 = vsel %vm68_vm1, %v924_v43, 0.0 }
 0x253   :  { %776 = vpow2.f32 %v594_v44  ;;  %459 = vadd.xlane.f32.xlu0 %v458_v45 }
 0x256   :  { %v322_v7 = vpop.permute.xlu2 %321 }
 0x257   :  { %v327_v17 = vsel %vm118_vm3, %v322_v7, 0 }
 0x259   :  { %v928_v46 = vpop.eup %776 }
 0x25a   :  { %v596_v47 = vsel %vm68_vm1, %v928_v46, 0.0 }
 0x25b   :  { %597 = vadd.xlane.f32.xlu2 %v596_v47 }
 0x260   :  { %v523_v48 = vpop.xlane.xlu1 %522 }
 0x261   :  { %v524_v49 = vsub.f32 %v894_v6, %v523_v48 }
 0x263   :  { %v525_v50 = vmul.f32 1.442695, %v524_v49 }
 0x265   :  { %778 = vpow2.f32 %v525_v50 }
 0x267   :  { %477 = vrot.lane.b32.xlu0 %v857_v12, %s805_s29 }
 0x26b   :  { %v935_v51 = vpop.eup %778 }
 0x26c   :  { %v527_v52 = vsel %vm68_vm1, %v935_v51, 0.0 }
 0x26d   :  { %528 = vadd.xlane.f32.xlu1 %v527_v52 }
 0x26f   :  { %408 = vrot.lane.b32.xlu0 %v857_v12, %s804_s28 }
 0x277   :  { %615 = vrot.lane.b32.xlu0 %v857_v12, %s806_s30 }
 0x278   :  { %v253_v53 = vpop.permute.xlu1 %252 }
 0x279   :  { %v258_v54 = vsel %vm118_vm3, %v253_v53, 0 }
 0x27a   :  { %267 = vmatpush.bf16.msrb.mxu1 %v258_v54 }
 0x27d   :  { %v96_v55 = vpop.xlane.xlu0 %95 }
 0x27e   :  { %780 = vrcp.f32 %v96_v55  ;;  %v108_v61 = vand.u32 2147483648, %v96_v55  ;;  %v106_v62 = vand.u32 2147483647, %v96_v55  ;;  %vm102_vm5 = vweird.f32 %v96_v55 }
 0x27f   :  { %546 = vrot.lane.b32.xlu0 %v857_v12, %s807_s5 }
 0x280   :  { %v109_v1 = vor.u32 1.1754944e-38, %v108_v61  ;;  %vm107_vm7 = vcmp.eq.f32.partialorder %v106_v62, 8.507059e+37 }
 0x284   :  { %v781_v56 = vpop.eup %780 }
 0x285   :  { %v98_v57 = vmul.f32 %v781_v56, %v96_v55  ;;  %v235_v58 = vpop.xlane.xlu0 %234  ;;  %vm103_vm4 = vweird.f32 %v781_v56 }
 0x286   :  { %782 = vrcp.f32 %v235_v58  ;;  %vm104_vm6 = vmor %vm102_vm5, %vm103_vm4  ;;  %v247_v10 = vand.u32 2147483648, %v235_v58  ;;  %v245_v11 = vand.u32 2147483647, %v235_v58  ;;  %vm241_vm9 = vweird.f32 %v235_v58 }
 0x287   :  { %v99_v59 = vsub.f32 1.0, %v98_v57 }
 0x288   :  { %v248_v18 = vor.u32 1.1754944e-38, %v247_v10  ;;  %vm246_vm11 = vcmp.eq.f32.partialorder %v245_v11, 8.507059e+37 }
 0x289   :  { %v100_v60 = vmul.f32 %v781_v56, %v99_v59 }
 0x28b   :  { %v101_v63 = vadd.f32 %v781_v56, %v100_v60 }
 0x28c   :  { %v783_v0 = vpop.eup %782 }
 0x28d   :  { %v237_v2 = vmul.f32 %v783_v0, %v235_v58  ;;  %v166_v3 = vpop.xlane.xlu0 %165  ;;  %v105_v4 = vsel %vm104_vm6, %v781_v56, %v101_v63  ;;  %vm242_vm8 = vweird.f32 %v783_v0 }
 0x28e   :  { %784 = vrcp.f32 %v166_v3  ;;  %v110_v5 = vsel %vm107_vm7, %v109_v1, %v105_v4  ;;  %vm243_vm10 = vmor %vm241_vm9, %vm242_vm8  ;;  %v178_v26 = vand.u32 2147483648, %v166_v3  ;;  %v176_v27 = vand.u32 2147483647, %v166_v3 }
 0x28f   :  { %v238_v12 = vsub.f32 1.0, %v237_v2  ;;  %v111_v6 = vmul.f32 %v902_v15, %v110_v5  ;;  %vm172_vm13 = vweird.f32 %v166_v3 }
 0x290   :  { %v179_v30 = vor.u32 1.1754944e-38, %v178_v26  ;;  %vm177_vm15 = vcmp.eq.f32.partialorder %v176_v27, 8.507059e+37 }
 0x291   :  { %v239_v9 = vmul.f32 %v783_v0, %v238_v12  ;;  %v112_v13 = vpack.c.bf16 %v111_v6, %v111_v6 }
 0x293   :  { %v240_v14 = vadd.f32 %v783_v0, %v239_v9  ;;  %705 = vmatmul.msk.bf16.vlgmr.msra.gmra.mxu2 %vm68_vm1, %v112_v13 }
 0x294   :  { %v785_v16 = vpop.eup %784  ;;  %336 = vmatpush.bf16.msra.mxu2 %v327_v17 }
 0x295   :  { %v168_v19 = vmul.f32 %v785_v16, %v166_v3  ;;  %v949_v20 = vpop.xlane.xlu0 %390  ;;  %v244_v15 = vsel %vm243_vm10, %v783_v0, %v240_v14  ;;  %vm173_vm12 = vweird.f32 %v785_v16 }
 0x296   :  { %v249_v22 = vsel %vm246_vm11, %v248_v18, %v244_v15  ;;  %vm174_vm14 = vmor %vm172_vm13, %vm173_vm12  ;;  %v403_v4 = vand.u32 2147483648, %v949_v20  ;;  %vm397_vm12 = vweird.f32 %v949_v20  ;;  %v401_v5 = vand.u32 2147483647, %v949_v20 }
 0x297   :  { %v169_v21 = vsub.f32 1.0, %v168_v19  ;;  %v250_v8 = vmul.f32 %v907_v23, %v249_v22 }
 0x298   :  { %v404_v14 = vor.u32 1.1754944e-38, %v403_v4 }
 0x299   :  { %v170_v24 = vmul.f32 %v785_v16, %v169_v21  ;;  %v251_v28 = vpack.c.bf16 %v250_v8, %v250_v8 }
 0x29b   :  { %v171_v29 = vadd.f32 %v785_v16, %v170_v24  ;;  %709 = vmatmul.msk.bf16.vlgmr.msrb.gmra.mxu1 %vm68_vm1, %v251_v28 }
 0x29d   :  { %v304_v32 = vpop.xlane.xlu0 %303  ;;  %v175_v33 = vsel %vm174_vm14, %v785_v16, %v171_v29  ;;  %vm402_vm14 = vcmp.eq.f32.partialorder %v401_v5, 8.507059e+37 }
 0x29e   :  { %786 = vrcp.f32 %v304_v32  ;;  %v180_v35 = vsel %vm177_vm15, %v179_v30, %v175_v33  ;;  %v316_v40 = vand.u32 2147483648, %v304_v32  ;;  %v314_v42 = vand.u32 2147483647, %v304_v32 }
 0x29f   :  { %v181_v36 = vmul.f32 %v911_v25, %v180_v35  ;;  %vm310_vm4 = vweird.f32 %v304_v32  ;;  %788 = vrcp.f32 %v949_v20 }
 0x2a0   :  { %v317_v45 = vor.u32 1.1754944e-38, %v316_v40  ;;  %vm315_vm6 = vcmp.eq.f32.partialorder %v314_v42, 8.507059e+37 }
 0x2a1   :  { %v182_v37 = vpack.c.bf16 %v181_v36, %v181_v36 }
 0x2a3   :  { %707 = vmatmul.msk.bf16.vlgmr.msrb.gmra.mxu2 %vm68_vm1, %v182_v37 }
 0x2a4   :  { %v787_v23 = vpop.eup %786 }
 0x2a5   :  { %v306_v38 = vmul.f32 %v787_v23, %v304_v32  ;;  %vm311_vm2 = vweird.f32 %v787_v23  ;;  %v789_v52 = vpop.eup %788 }
 0x2a6   :  { %vm312_vm5 = vmor %vm310_vm4, %vm311_vm2  ;;  %v393_v53 = vmul.f32 %v789_v52, %v949_v20  ;;  %vm398_vm9 = vweird.f32 %v789_v52 }
 0x2a7   :  { %v307_v39 = vsub.f32 1.0, %v306_v38  ;;  %vm399_vm13 = vmor %vm397_vm12, %vm398_vm9 }
 0x2a8   :  { %v394_v55 = vsub.f32 1.0, %v393_v53 }
 0x2a9   :  { %v308_v41 = vmul.f32 %v787_v23, %v307_v39 }
 0x2aa   :  { %v395_v60 = vmul.f32 %v789_v52, %v394_v55 }
 0x2ab   :  { %v309_v44 = vadd.f32 %v787_v23, %v308_v41 }
 0x2ac   :  { %v396_v1 = vadd.f32 %v789_v52, %v395_v60 }
 0x2ad   :  { %v313_v47 = vsel %vm312_vm5, %v787_v23, %v309_v44 }
 0x2ae   :  { %v318_v48 = vsel %vm315_vm6, %v317_v45, %v313_v47  ;;  %v400_v10 = vsel %vm399_vm13, %v789_v52, %v396_v1  ;;  %v731_v1 = vld [vmem:[%s995_s2] sm:$0xff] }
 0x2af   :  { %v319_v49 = vmul.f32 %v919_v34, %v318_v48  ;;  %v405_v17 = vsel %vm402_vm14, %v404_v14, %v400_v10 }
 0x2b0   :  { %v406_v20 = vmul.f32 %v915_v31, %v405_v17 }
 0x2b1   :  { %v320_v25 = vpack.c.bf16 %v319_v49, %v319_v49 }
 0x2b2   :  { %v407_v26 = vpack.c.bf16 %v406_v20, %v406_v20  ;;  %v763_v20 = vld [vmem:[%s994_s3] ss:$0 sm:$0xff] }
 0x2b3   :  { %711 = vmatmul.msk.bf16.vlgmr.msra.gmra.mxu2 %vm68_vm1, %v320_v25 }
 0x2c6   :  { %v460_v50 = vpop.xlane.xlu0 %459 }
 0x2c7   :  { %790 = vrcp.f32 %v460_v50  ;;  %v472_v59 = vand.u32 2147483648, %v460_v50  ;;  %v470_v34 = vand.u32 2147483647, %v460_v50  ;;  %vm466_vm8 = vweird.f32 %v460_v50 }
 0x2c9   :  { %v473_v0 = vor.u32 1.1754944e-38, %v472_v59  ;;  %vm471_vm11 = vcmp.eq.f32.partialorder %v470_v34, 8.507059e+37 }
 0x2cd   :  { %v791_v54 = vpop.eup %790 }
 0x2ce   :  { %v462_v56 = vmul.f32 %v791_v54, %v460_v50  ;;  %v598_v57 = vpop.xlane.xlu2 %597  ;;  %vm467_vm7 = vweird.f32 %v791_v54 }
 0x2cf   :  { %792 = vrcp.f32 %v598_v57  ;;  %vm468_vm10 = vmor %vm466_vm8, %vm467_vm7  ;;  %v610_v19 = vand.u32 2147483648, %v598_v57  ;;  %vm604_vm2 = vweird.f32 %v598_v57 }
 0x2d0   :  { %v463_v58 = vsub.f32 1.0, %v462_v56 }
 0x2d1   :  { %v611_v24 = vor.u32 1.1754944e-38, %v610_v19 }
 0x2d2   :  { %v464_v61 = vmul.f32 %v791_v54, %v463_v58 }
 0x2d4   :  { %v465_v62 = vadd.f32 %v791_v54, %v464_v61 }
 0x2d5   :  { %v793_v63 = vpop.eup %792 }
 0x2d6   :  { %v469_v2 = vsel %vm468_vm10, %v791_v54, %v465_v62  ;;  %v600_v3 = vmul.f32 %v793_v63, %v598_v57  ;;  %vm605_vm15 = vweird.f32 %v793_v63  ;;  %vm357_vm10 = vcmask 195584  }
 0x2d7   :  { %v474_v12 = vsel %vm471_vm11, %v473_v0, %v469_v2  ;;  %vm606_vm4 = vmor %vm604_vm2, %vm605_vm15  ;;  %v732_v0 = vld [vmem:[%s995_s2 + $0x8] sm:$0xff] }
 0x2d8   :  { %v475_v6 = vmul.f32 %v924_v43, %v474_v12  ;;  %v601_v7 = vsub.f32 1.0, %v600_v3  ;;  %v608_v43 = vand.u32 2147483647, %v598_v57  ;;  %681 = vmatpush.bf16.msra.mxu0 %v732_v0 }
 0x2d9   :  { %v478_v9 = vpop.permute.xlu0 %477 }
 0x2da   :  { %v602_v11 = vmul.f32 %v793_v63, %v601_v7  ;;  %v483_v13 = vsel %vm118_vm3, %v478_v9, 0  ;;  %v476_v16 = vpack.c.bf16 %v475_v6, %v475_v6  ;;  %vm609_vm5 = vcmp.eq.f32.partialorder %v608_v43, 8.507059e+37 }
 0x2db   :  { %492 = vmatpush.bf16.msrb.mxu2 %v483_v13 }
 0x2dc   :  { %v603_v18 = vadd.f32 %v793_v63, %v602_v11  ;;  %682 = vmatpush.bf16.msra.mxu0 %v731_v1 }
 0x2de   :  { %715 = vmatmul.msk.bf16.vlgmr.msrb.gmra.mxu2 %vm68_vm1, %v476_v16  ;;  %v607_v22 = vsel %vm606_vm4, %v793_v63, %v603_v18 }
 0x2df   :  { %v612_v27 = vsel %vm609_vm5, %v611_v24, %v607_v22 }
 0x2e0   :  { %v529_v15 = vpop.xlane.xlu1 %528  ;;  %v613_v29 = vmul.f32 %v928_v46, %v612_v27 }
 0x2e1   :  { %794 = vrcp.f32 %v529_v15  ;;  %v409_v21 = vpop.permute.xlu0 %408  ;;  %v541_v35 = vand.u32 2147483648, %v529_v15  ;;  %v539_v37 = vand.u32 2147483647, %v529_v15  ;;  %vm535_vm7 = vweird.f32 %v529_v15 }
 0x2e2   :  { %v414_v8 = vsel %vm118_vm3, %v409_v21, 0  ;;  %v614_v23 = vpack.c.bf16 %v613_v29, %v613_v29 }
 0x2e3   :  { %423 = vmatpush.bf16.msra.mxu1 %v414_v8  ;;  %v542_v39 = vor.u32 1.1754944e-38, %v541_v35  ;;  %vm540_vm9 = vcmp.eq.f32.partialorder %v539_v37, 8.507059e+37 }
 0x2e6   :  { %713 = vmatmul.msk.bf16.vlgmr.msra.gmra.mxu1 %vm68_vm1, %v407_v26 }
 0x2e7   :  { %v795_v28 = vpop.eup %794 }
 0x2e8   :  { %v531_v31 = vmul.f32 %v795_v28, %v529_v15  ;;  %vm536_vm6 = vweird.f32 %v795_v28 }
 0x2e9   :  { %v616_v30 = vpop.permute.xlu0 %615  ;;  %vm537_vm8 = vmor %vm535_vm7, %vm536_vm6 }
 0x2ea   :  { %v532_v32 = vsub.f32 1.0, %v531_v31  ;;  %v621_v33 = vsel %vm118_vm3, %v616_v30, 0 }
 0x2eb   :  { %630 = vmatpush.bf16.msra.mxu2 %v621_v33 }
 0x2ec   :  { %v533_v36 = vmul.f32 %v795_v28, %v532_v32 }
 0x2ee   :  { %v534_v38 = vadd.f32 %v795_v28, %v533_v36  ;;  %719 = vmatmul.msk.bf16.vlgmr.msra.gmra.mxu2 %vm68_vm1, %v614_v23 }
 0x2f0   :  { %v538_v40 = vsel %vm537_vm8, %v795_v28, %v534_v38 }
 0x2f1   :  { %v543_v46 = vsel %vm540_vm9, %v542_v39, %v538_v40  ;;  %v547_v41 = vpop.permute.xlu0 %546 }
 0x2f2   :  { %v544_v42 = vmul.f32 %v935_v51, %v543_v46  ;;  %v552_v44 = vsel %vm118_vm3, %v547_v41, 0  ;;  %vm355_vm3 = vcmask 130048  }
 0x2f3   :  { %561 = vmatpush.bf16.msrb.mxu1 %v552_v44 }
 0x2f4   :  { %v545_v45 = vpack.c.bf16 %v544_v42, %v544_v42 }
 0x2f6   :  { %717 = vmatmul.msk.bf16.vlgmr.msrb.gmra.mxu1 %vm68_vm1, %v545_v45 }
 0x316   :  { %v131_v47 = vpop.f32.mrf.mxu2 }
 0x318   :  { %v269_v48 = vpop.f32.mrf.mxu1 }
 0x31e   :  { %v133_v49 = vpop.f32.mrf.mxu2 }
 0x320   :  { %v271_v25 = vpop.f32.mrf.mxu1 }
 0x326   :  { %v200_v50 = vpop.f32.mrf.mxu2 }
 0x32e   :  { %v202_v52 = vpop.f32.mrf.mxu2 }
 0x336   :  { %v338_v53 = vpop.f32.mrf.mxu2 }
 0x33e   :  { %v340_v54 = vpop.f32.mrf.mxu2 }
 0x361   :  { %v494_v55 = vpop.f32.mrf.mxu2 }
 0x362   :  { %v748_v56 = vpack.i.bf16 %v494_v55, %v200_v50 }
 0x363   :  { %v425_v57 = vpop.f32.mrf.mxu1 }
 0x364   :  { %749 = vrot.lane.b32.xlu2 %v748_v56, %s808_s6 }
 0x369   :  { %v496_v51 = vpop.f32.mrf.mxu2 }
 0x36b   :  { %v427_v58 = vpop.f32.mrf.mxu1 }
 0x371   :  { %v632_v59 = vpop.f32.mrf.mxu2 }
 0x372   :  { %v758_v60 = vpack.i.bf16 %v632_v59, %v338_v53 }
 0x373   :  { %v563_v61 = vpop.f32.mrf.mxu1 }
 0x374   :  { %v753_v34 = vpack.i.bf16 %v563_v61, %v269_v48  ;;  %759 = vrot.lane.b32.xlu0 %v758_v60, %s809_s7 }
 0x376   :  { %754 = vrot.lane.b32.xlu1 %v753_v34, %s810_s8 }
 0x379   :  { %v634_v62 = vpop.f32.mrf.mxu2 }
 0x37b   :  { %v565_v63 = vpop.f32.mrf.mxu1 }
 0x3be   :  { %v750_v2 = vpop.permute.xlu2 %749 }
 0x3bf   :  { %v752_v3 = vunpack.i.h.bf16 %v750_v2  ;;  %v751_v4 = vunpack.i.l.bf16 %v750_v2 }
 0x3c1   :  { %v354_v9 = vsel %vm68_vm1, %v131_v47, %v751_v4  ;;  %v648_v10 = vsel %vm68_vm1, %v425_v57, %v752_v3 }
 0x3e6   :  { %v760_v12 = vpop.permute.xlu0 %759 }
 0x3e7   :  { %v762_v11 = vunpack.i.h.bf16 %v760_v12  ;;  %v761_v13 = vunpack.i.l.bf16 %v760_v12 }
 0x3e8   :  { %v755_v5 = vpop.permute.xlu1 %754 }
 0x3e9   :  { %v757_v6 = vunpack.i.h.bf16 %v755_v5  ;;  %v756_v7 = vunpack.i.l.bf16 %v755_v5 }
 0x3eb   :  { %v649_v14 = vsel %vm355_vm3, %v648_v10, %v757_v6  ;;  %v356_v16 = vsel %vm355_vm3, %v354_v9, %v756_v7 }
 0x3ec   :  { %v358_v17 = vsel %vm357_vm10, %v356_v16, %v761_v13  ;;  %v650_v18 = vsel %vm357_vm10, %v649_v14, %v762_v11 }
 0x3ed   :  { %v651_v19 = vpack.c.bf16 %v650_v18, %v358_v17 }
 0x3ef   :  { %728 = vmatmul.msk.bf16.vlgmr.msra.gmra.mxu0 %vm37_vm0, %v651_v19 }
 0x46c   :  { %v684_v43 = vpop.f32.mrf.mxu0 }
 0x46d   :  { %v685_v15 = vadd.f32 %v763_v20, %v684_v43 }
 0x46f   :  { %689 = vst [vmem:[%s996_s4] sm:$0xff] %v685_v15 }
 0x474   :  { %v686_v21 = vpop.f32.mrf.mxu0 }
 0x475   :  { %v687_v22 = vadd.f32 %v763_v20, %v686_v21 }
 0x477   :  { %690 = vst [vmem:[%s996_s4 + $0x8] sm:$0xff] %v687_v22 }

</bundles_post_ra>
